<compile_context>
chip_gen: v6e
topology: v6e:2x2x1
jax: 0.10.0
libtpu: 0.0.40
codegen_flags: <defaults>
</compile_context>

<pallas_src>
import jax
import jax.numpy as jnp
from jax.experimental import pallas as pl
from jax.experimental.pallas import tpu as pltpu


def _identity_copy_kernel(x_ref, o_ref):
    # The Neuron "module marker end" custom call is an identity on its
    # operands; the only data semantics to reproduce are a pass-through.
    o_ref[...] = x_ref[...]


_LANE_CANDIDATES = (4096, 2048, 1024, 512, 256, 128)  # lane-dense slab widths
_BLOCK_BYTES_CAP = 4 * 1024 * 1024   # per-block cap: 2 bufs x (in+out) ~= 16 MiB VMEM
_TINY_BYTES = 4096                   # <= one vreg: not worth a kernel launch


def _min_sublane_rows(dtype):
    """Dtype-aware sublane packing minimum for the block's second-to-last dim."""
    itemsize = jnp.dtype(dtype).itemsize
    if itemsize >= 4:
        return 8
    if itemsize == 2:
        return 16
    return 32


def _marker_identity_2d(x2d, tile_m, grid_m):
    """Tiled identity copy of a lane-dense 2D slab through a Pallas kernel."""
    M, LANE = x2d.shape
    return pl.pallas_call(
        _identity_copy_kernel,
        out_shape=jax.ShapeDtypeStruct((M, LANE), x2d.dtype),
        grid_spec=pltpu.PrefetchScalarGridSpec(
            num_scalar_prefetch=0,
            grid=(grid_m,),
            in_specs=[pl.BlockSpec((tile_m, LANE), lambda i: (i, 0))],
            out_specs=pl.BlockSpec((tile_m, LANE), lambda i: (i, 0)),
        ),
        # True identity: output aliases the input buffer.  With a donated
        # operand this is an in-place no-op; otherwise XLA adds one copy.
        input_output_aliases={0: 0},
        compiler_params=pltpu.CompilerParams(
            dimension_semantics=("parallel",),        # splits rows across v7x TCs
            vmem_limit_bytes=32 * 1024 * 1024,        # safe on v5e/v6e/v7x
        ),
    )(x2d)


def _marker_identity(a):
    """Identity pass-through of one marker operand."""
    a = jnp.asarray(a)
    size = a.size
    itemsize = jnp.dtype(a.dtype).itemsize

    # Tiny / scalar operands: a kernel launch costs far more than the data —
    # the marker is an identity, so just return the value.
    if a.ndim == 0 or size * itemsize <= _TINY_BYTES:
        return a

    # Pick a lane-dense slab width (large multiple of 128) that exactly
    # divides the flattened size, so no padding / slicing HBM round-trips.
    lane = next((l for l in _LANE_CANDIDATES if size % l == 0), None)
    if lane is None:
        # Ragged total size: padding would add two extra HBM copies around an
        # identity kernel — pass the value through unchanged instead.
        return a

    orig_shape = a.shape
    M = size // lane
    x2d = a.reshape(M, lane)

    min_rows = _min_sublane_rows(a.dtype)
    if M <= min_rows:
        # Single block equal to the full array dims (exempt from the (8,128)
        # divisibility rule).
        tile_m, grid_m = M, 1
    else:
        rows_cap = max(
            min_rows,
            (_BLOCK_BYTES_CAP // (lane * itemsize)) // min_rows * min_rows,
        )
        tile_m = min(rows_cap, (M // min_rows) * min_rows)
        grid_m = pl.cdiv(M, tile_m)  # ragged last block is masked by Pallas

    y2d = _marker_identity_2d(x2d, tile_m, grid_m)
    return y2d.reshape(orig_shape)


def module_marker_end_wrapper(*args):
    """JAX/Pallas equivalent of ModuleMarkerEndWrapper.forward(*args).

    Single argument -> that argument; multiple arguments -> tuple of them.
    """
    # TODO(synk): the Neuron compiler-side boundary annotation
    # (AwsNeuronModuleMarkerEndForward custom call) has no Pallas equivalent;
    # only its identity data semantics are reproduced here.
    outs = tuple(_marker_identity(a) for a in args)
    if len(outs) == 1:
        return outs[0]
    return outs


if __name__ == "__main__":
    key = jax.random.PRNGKey(0)
    k1, k2 = jax.random.split(key)

    # NCHW input (PyTorch conv convention) plus a second operand to exercise
    # the multi-arg (tuple) path of the marker.
    x = jax.random.normal(k1, (2, 4, 16, 16), dtype=jnp.float32)
    h = jax.random.normal(k2, (2, 8, 32), dtype=jnp.float32)

    # Single-arg case: identity (goes through the Pallas copy kernel).
    y = module_marker_end_wrapper(x)
    y = jax.block_until_ready(y)
    assert y.shape == x.shape and y.dtype == x.dtype
    assert bool(jnp.allclose(y, x))

    # Multi-arg case: tuple identity (h takes the tiny fast path).
    y1, y2 = module_marker_end_wrapper(x, h)
    jax.block_until_ready((y1, y2))
    assert bool(jnp.allclose(y1, x)) and bool(jnp.allclose(y2, h))

    print("KERNEL_OK")
</pallas_src>

<mosaic_0001>
module attributes {stable_mosaic.version = 11 : i64} {
  func.func @_identity_copy_kernel(%arg0: i32, %arg1: memref<1x2048xf32, #tpu.memory_space<vmem>>, %arg2: memref<1x2048xf32, #tpu.memory_space<vmem>>) attributes {dimension_semantics = [#tpu.dimension_semantics<parallel>], iteration_bounds = array<i64: 1>, scalar_prefetch = 0 : i64, scratch_operands = 0 : i64, tpu.core_type = #tpu.core_type<tc>, window_params = [{transform_indices = @transform_0, window_bounds = array<i64: 1, 2048>}, {transform_indices = @transform_1, window_bounds = array<i64: 1, 2048>}]} {
    %c0 = arith.constant 0 : index
    %c0_0 = arith.constant 0 : index
    %0 = vector.load %arg1[%c0, %c0_0] : memref<1x2048xf32, #tpu.memory_space<vmem>>, vector<1x2048xf32>
    %c0_1 = arith.constant 0 : index
    %c0_2 = arith.constant 0 : index
    %1 = vector.load %arg2[%c0_1, %c0_2] : memref<1x2048xf32, #tpu.memory_space<vmem>>, vector<1x2048xf32>
    tpu.vector_store %arg2[%c0_1, %c0_2], %0 {strides = array<i32>} : memref<1x2048xf32, #tpu.memory_space<vmem>>, vector<1x2048xf32>,
    return
  }
  func.func @transform_0(%arg0: i32) -> (i32, i32) {
    %c0_i32 = arith.constant 0 : i32
    %c0_i32_0 = arith.constant 0 : i32
    return %arg0, %c0_i32 : i32, i32
  }
  func.func @transform_1(%arg0: i32) -> (i32, i32) {
    %c0_i32 = arith.constant 0 : i32
    %c0_i32_0 = arith.constant 0 : i32
    return %arg0, %c0_i32 : i32, i32
  }
}

</mosaic_0001>

<bundles_post_ra>
// kernel: tpu_custom_call.1
= control target key start
LH: loop header
LB: loop body
LE: loop exit
PB: predicated region body
PF: predicated region fallthrough
CT: control target
= control target key end

     0   :  { %6 = vsyncpa [#allocation3], 0  ;;  %s104_s0 = inlined_call_operand.hbm [shape: f32[1,2048], index: 0, kind: input, shape index: {}, may-alias: {0,1}]   ;;  %s105_s1 = inlined_call_operand.hbm [shape: f32[1,2048], index: 1, kind: output, shape index: {}, may-alias: {0,1}]  }
   0x1   :  { %7 = vsyncpa [#allocation4], 0  ;;  %s86_s6 = smov [#allocation2]  }
   0x2   :  { %s14_s7 = sshll.u32 %s86_s6, 4  ;;  %s15_s7 = int_to_ptr.vmem [resolvable:$true] %s14_s7 }
   0x3   :  { %s50_s8 = scalar_lea.vmem %s15_s7, 256  ;;  %p55_p1 = scmp.lt.s32.totalorder %s15_s7, %s15_s7 }
   0x4   :  { %p51_p0 = scmp.ne.s32.totalorder %s15_s7, %s50_s8  ;;  %p56_p2 = scmp.lt.s32.totalorder %s50_s8, %s50_s8 }
   0x6   :  { %p57_p3 = por %p56_p2, %p55_p1 }
   0x8   :  { %p58_p4 = pnand %p57_p3, %p51_p0 }
   0xa   :  { %61 = shalt.err (!%p58_p4)
}
   0xb   :  { %17 = dma.hbm_to_vmem [thread:$0]  %s104_s0, 256, %s15_s7, [#allocation3]  }
   0xc   :  { %82 = dma.done.wait [#allocation3], 256  }
   0xd   :  { %83 = vsyncadd [#allocation3], 4294967040  ;;  %s87_s11 = smov [#allocation5]   ;;  %v21_v0 = vld [vmem:[#allocation2] sm:$0xff]  ;;  %v22_v1 = vld [vmem:[#allocation2 + $0x8] sm:$0xff] }
   0xe   :  { %s31_s12 = sshll.u32 %s87_s11, 4  ;;  %23 = vst [vmem:[#allocation5] sm:$0xff] %v21_v0  ;;  %24 = vst [vmem:[#allocation5 + $0x8] sm:$0xff] %v22_v1  ;;  %s32_s12 = int_to_ptr.vmem [resolvable:$true] %s31_s12 }
   0xf   :  { %s62_s13 = scalar_lea.vmem %s32_s12, 256  ;;  %p67_p6 = scmp.lt.s32.totalorder %s32_s12, %s32_s12 }
  0x10   :  { %p63_p5 = scmp.ne.s32.totalorder %s32_s12, %s62_s13  ;;  %p68_p7 = scmp.lt.s32.totalorder %s62_s13, %s62_s13 }
  0x12   :  { %p69_p8 = por %p68_p7, %p67_p6 }
  0x14   :  { %p70_p9 = pnand %p69_p8, %p63_p5 }
  0x16   :  { %73 = shalt.err (!%p70_p9)
}
  0x17   :  { %34 = dma.vmem_to_hbm [thread:$0]  %s32_s12, 256, %s105_s1, [#allocation4]  }
  0x18   :  { %84 = dma.done.wait [#allocation4], 256  }
  0x19   :  { %85 = vsyncadd [#allocation4], 4294967040 }
  0x1a   :  { %38 = vsyncpa [#allocation3], 1 }
  0x1b   :  { %39 = vsyncpa [#allocation4], 1 }

</bundles_post_ra>
